<compile_context>
chip_gen: v7x
topology: tpu7x:2x2x1
jax: 0.10.0
libtpu: 0.0.40
codegen_flags: <defaults>
</compile_context>

<pallas_src>
import functools

import jax
import jax.numpy as jnp
from jax.experimental import pallas as pl
from jax.experimental.pallas import tpu as pltpu

HIDDEN = 64
LANE = 128


def _round_up(n, m):
    return ((n + m - 1) // m) * m


def _supports_bf16_act():
    """bf16 VPU/EUP exist on v6e/v7x; keep f32 activation math elsewhere."""
    try:
        kind = jax.devices()[0].device_kind.lower()
    except Exception:
        return False
    return any(tag in kind for tag in ("v6", "v7", "7x"))


def _value_fn_kernel(xT_ref,
                     w1T_ref, b1_ref,
                     w2T_ref, b2_ref,
                     w3T_ref, b3_ref,
                     w4T_ref, b4_ref,
                     out_ref, *, act_dtype):
    """One batch tile of the MLP in transposed (feature-major) layout.

    xT_ref: (S, T) bf16, wℓT_ref: (H, in) bf16, bℓ_ref: (H, 1) act_dtype,
    w4T_ref: (1, H) bf16, b4_ref: (1, 1) f32, out_ref: (1, T) f32.
    """
    bf16 = jnp.bfloat16
    xT = xT_ref[...]                                             # (S, T) bf16

    def layer(w_ref, h, b_ref, fn):
        acc = jnp.dot(w_ref[...], h.astype(bf16),
                      preferred_element_type=jnp.float32)        # (H, T) f32
        return fn(acc.astype(act_dtype) + b_ref[...])            # (H, T) act_dtype

    h1 = layer(w1T_ref, xT, b1_ref, jnp.tanh)
    h2 = layer(w2T_ref, h1, b2_ref, jnp.tanh)
    h3 = layer(w3T_ref, h2, b3_ref, lambda v: jnp.maximum(v, 0))

    # Head: (1, H) @ (H, T) -> lane-dense (1, T) value row.
    v = jnp.dot(w4T_ref[...], h3.astype(bf16),
                preferred_element_type=jnp.float32) + b4_ref[...]
    out_ref[...] = v.astype(out_ref.dtype)


def value_function_forward(x, params, *, tile_b=4096, act_dtype=None):
    """V(s) forward.  x: (B, state_dim) f32.  Returns (B, 1) f32."""
    (w1, b1), (w2, b2), (w3, b3), (w4, b4) = params
    B, S = x.shape
    H = w1.shape[1]

    if act_dtype is None:
        act_dtype = jnp.bfloat16 if _supports_bf16_act() else jnp.float32
    bf16 = jnp.bfloat16

    # --- batch tiling: lane-aligned, and >=2 tiles when the batch permits -----
    tile_b = max(LANE, _round_up(int(tile_b), LANE))
    b_pad_min = _round_up(B, LANE)
    half = max(LANE, _round_up(pl.cdiv(b_pad_min, 2), LANE))
    tile_b = min(tile_b, half)
    num_tiles = pl.cdiv(b_pad_min, tile_b)
    b_pad = num_tiles * tile_b

    # --- operand prep: transpose so batch is on lanes --------------------------
    xT = x.astype(bf16).T                                   # (S, B) bf16, lane-dense
    if b_pad != B:
        xT = jnp.pad(xT, ((0, 0), (0, b_pad - B)))

    w1T = w1.T.astype(bf16)                                  # (H, S)
    w2T = w2.T.astype(bf16)                                  # (H, H)
    w3T = w3.T.astype(bf16)                                  # (H, H)
    w4T = w4.T.astype(bf16)                                  # (1, H)
    b1T = b1.reshape(H, 1).astype(act_dtype)
    b2T = b2.reshape(H, 1).astype(act_dtype)
    b3T = b3.reshape(H, 1).astype(act_dtype)
    b4s = b4.reshape(1, 1).astype(jnp.float32)

    def const(a):
        nd = a.ndim
        return pl.BlockSpec(a.shape, lambda i, _nd=nd: (0,) * _nd)

    flops = 2 * b_pad * (S * H + H * H + H * H + H)
    bytes_accessed = (
        xT.size * 2 + b_pad * 4
        + sum(int(a.size) * a.dtype.itemsize
              for a in (w1T, b1T, w2T, b2T, w3T, b3T, w4T, b4s))
    )
    cost = pl.CostEstimate(flops=int(flops),
                           transcendentals=int(2 * b_pad * H),
                           bytes_accessed=int(bytes_accessed))

    kernel = functools.partial(_value_fn_kernel, act_dtype=act_dtype)

    out_row = pl.pallas_call(
        kernel,
        out_shape=jax.ShapeDtypeStruct((1, b_pad), jnp.float32),
        grid=(num_tiles,),
        in_specs=[pl.BlockSpec((S, tile_b), lambda i: (0, i)),
                  const(w1T), const(b1T),
                  const(w2T), const(b2T),
                  const(w3T), const(b3T),
                  const(w4T), const(b4s)],
        out_specs=pl.BlockSpec((1, tile_b), lambda i: (0, i)),
        compiler_params=pltpu.CompilerParams(
            dimension_semantics=("parallel",),
            vmem_limit_bytes=48 * 1024 * 1024),
        cost_estimate=cost,
    )(xT, w1T, b1T, w2T, b2T, w3T, b3T, w4T, b4s)

    # (1, b_pad) lane-dense row -> (B, 1)
    return out_row.reshape(-1)[:B].reshape(B, 1)


def init_params(key, state_dim):
    """PyTorch-style init U(-1/sqrt(fan_in), +1/sqrt(fan_in)).

    Weights stored as (in, out) so y = x @ W + b; biases as (1, out).
    """
    dims = [state_dim, HIDDEN, HIDDEN, HIDDEN, 1]
    params = []
    for i in range(4):
        fan_in, fan_out = dims[i], dims[i + 1]
        key, kw, kb = jax.random.split(key, 3)
        bound = 1.0 / jnp.sqrt(jnp.float32(fan_in))
        w = jax.random.uniform(kw, (fan_in, fan_out), jnp.float32, -bound, bound)
        b = jax.random.uniform(kb, (1, fan_out), jnp.float32, -bound, bound)
        params.append((w, b))
    return params


def value_function_ref(x, params, act_dtype=jnp.float32):
    """Pure-JAX reference mirroring the kernel's numeric path (bf16 matmul,
    f32 accumulate, activations in act_dtype)."""
    (w1, b1), (w2, b2), (w3, b3), (w4, b4) = params
    bf16 = jnp.bfloat16

    def dot(a, w):
        return jnp.dot(a.astype(bf16), w.astype(bf16),
                       preferred_element_type=jnp.float32)

    h = jnp.tanh(dot(x, w1).astype(act_dtype) + b1.astype(act_dtype))
    h = jnp.tanh(dot(h, w2).astype(act_dtype) + b2.astype(act_dtype))
    h = jnp.maximum(dot(h, w3).astype(act_dtype) + b3.astype(act_dtype), 0)
    return dot(h, w4) + b4


def value_function_ref_f32(x, params):
    """Full-f32 reference (PyTorch semantics) for a sanity check."""
    (w1, b1), (w2, b2), (w3, b3), (w4, b4) = params
    h = jnp.tanh(x @ w1 + b1)
    h = jnp.tanh(h @ w2 + b2)
    h = jnp.maximum(h @ w3 + b3, 0.0)
    return h @ w4 + b4


if __name__ == "__main__":
    # TODO(synk): is_image_obs=True branch (Conv2d + BatchNorm2d + flatten) not
    # implemented; only the default vector-observation path is translated.
    key = jax.random.PRNGKey(0)
    k_param, k_x = jax.random.split(key)

    STATE_DIM = 4          # e.g. ValueFunction(state_dim=(4,))
    BATCH = 512            # exercises multi-tile grid (2 tiles of 256)

    act_dtype = jnp.bfloat16 if _supports_bf16_act() else jnp.float32

    params = init_params(k_param, STATE_DIM)
    x = jax.random.normal(k_x, (BATCH, STATE_DIM), jnp.float32)

    out = value_function_forward(x, params)
    out = jax.block_until_ready(out)
    ref = value_function_ref(x, params, act_dtype=act_dtype)
    ref32 = value_function_ref_f32(x, params)
    assert out.shape == (BATCH, 1), out.shape
    assert jnp.allclose(out, ref, atol=1e-2, rtol=1e-2), (out[:4], ref[:4])
    assert jnp.allclose(out, ref32, atol=5e-2), (out[:4], ref32[:4])

    # Ragged / tiny batch path (padding to a full lane tile inside the wrapper).
    x_small = jax.random.normal(jax.random.PRNGKey(1), (2, STATE_DIM), jnp.float32)
    out_small = jax.block_until_ready(value_function_forward(x_small, params))
    ref_small = value_function_ref(x_small, params, act_dtype=act_dtype)
    assert out_small.shape == (2, 1), out_small.shape
    assert jnp.allclose(out_small, ref_small, atol=1e-2, rtol=1e-2)

    print("KERNEL_OK")
</pallas_src>

<mosaic_0001>
module attributes {stable_mosaic.version = 11 : i64} {
  func.func @_value_fn_kernel(%arg0: i32, %arg1: memref<4x256xbf16, #tpu.memory_space<vmem>>, %arg2: memref<64x4xbf16, #tpu.memory_space<vmem>>, %arg3: memref<64x1xf32, #tpu.memory_space<vmem>>, %arg4: memref<64x64xbf16, #tpu.memory_space<vmem>>, %arg5: memref<64x1xf32, #tpu.memory_space<vmem>>, %arg6: memref<64x64xbf16, #tpu.memory_space<vmem>>, %arg7: memref<64x1xf32, #tpu.memory_space<vmem>>, %arg8: memref<1x64xbf16, #tpu.memory_space<vmem>>, %arg9: memref<1x1xf32, #tpu.memory_space<vmem>>, %arg10: memref<1x256xf32, #tpu.memory_space<vmem>>) attributes {dimension_semantics = [#tpu.dimension_semantics<parallel>], iteration_bounds = array<i64: 2>, scalar_prefetch = 0 : i64, scratch_operands = 0 : i64, tpu.core_type = #tpu.core_type<tc>, window_params = [{transform_indices = @transform_0, window_bounds = array<i64: 4, 256>}, {pipeline_mode = #tpu.pipeline_mode<synchronous>, transform_indices = @transform_1, window_bounds = array<i64: 64, 4>}, {pipeline_mode = #tpu.pipeline_mode<synchronous>, transform_indices = @transform_2, window_bounds = array<i64: 64, 1>}, {pipeline_mode = #tpu.pipeline_mode<synchronous>, transform_indices = @transform_3, window_bounds = array<i64: 64, 64>}, {pipeline_mode = #tpu.pipeline_mode<synchronous>, transform_indices = @transform_4, window_bounds = array<i64: 64, 1>}, {pipeline_mode = #tpu.pipeline_mode<synchronous>, transform_indices = @transform_5, window_bounds = array<i64: 64, 64>}, {pipeline_mode = #tpu.pipeline_mode<synchronous>, transform_indices = @transform_6, window_bounds = array<i64: 64, 1>}, {pipeline_mode = #tpu.pipeline_mode<synchronous>, transform_indices = @transform_7, window_bounds = array<i64: 1, 64>}, {pipeline_mode = #tpu.pipeline_mode<synchronous>, transform_indices = @transform_8, window_bounds = array<i64: 1, 1>}, {transform_indices = @transform_9, window_bounds = array<i64: 1, 256>}]} {
    %c0 = arith.constant 0 : index
    %c0_0 = arith.constant 0 : index
    %0 = vector.load %arg1[%c0, %c0_0] : memref<4x256xbf16, #tpu.memory_space<vmem>>, vector<4x256xbf16>
    %c0_1 = arith.constant 0 : index
    %c0_2 = arith.constant 0 : index
    %1 = vector.load %arg2[%c0_1, %c0_2] : memref<64x4xbf16, #tpu.memory_space<vmem>>, vector<64x4xbf16>
    %cst = arith.constant dense<0.000000e+00> : vector<64x256xf32>
    %2 = tpu.matmul %1, %0, %cst {dimension_numbers = #tpu.dot_dimension_numbers<[1], [0], [0], [1], [0, 0, 1, 1], [], []>} : vector<64x4xbf16>, vector<4x256xbf16>, vector<64x256xf32> -> vector<64x256xf32>
    %c0_3 = arith.constant 0 : index
    %c0_4 = arith.constant 0 : index
    %3 = vector.load %arg3[%c0_3, %c0_4] : memref<64x1xf32, #tpu.memory_space<vmem>>, vector<64x1xf32>
    %4 = vector.broadcast %3 : vector<64x1xf32> to vector<64x256xf32>
    %5 = arith.addf %2, %4 : vector<64x256xf32>
    %6 = math.tanh %5 : vector<64x256xf32>
    %c0_5 = arith.constant 0 : index
    %c0_6 = arith.constant 0 : index
    %7 = vector.load %arg4[%c0_5, %c0_6] : memref<64x64xbf16, #tpu.memory_space<vmem>>, vector<64x64xbf16>
    %8 = arith.truncf %6 : vector<64x256xf32> to vector<64x256xbf16>
    %cst_7 = arith.constant dense<0.000000e+00> : vector<64x256xf32>
    %9 = tpu.matmul %7, %8, %cst_7 {dimension_numbers = #tpu.dot_dimension_numbers<[1], [0], [0], [1], [0, 0, 1, 1], [], []>} : vector<64x64xbf16>, vector<64x256xbf16>, vector<64x256xf32> -> vector<64x256xf32>
    %c0_8 = arith.constant 0 : index
    %c0_9 = arith.constant 0 : index
    %10 = vector.load %arg5[%c0_8, %c0_9] : memref<64x1xf32, #tpu.memory_space<vmem>>, vector<64x1xf32>
    %11 = vector.broadcast %10 : vector<64x1xf32> to vector<64x256xf32>
    %12 = arith.addf %9, %11 : vector<64x256xf32>
    %13 = math.tanh %12 : vector<64x256xf32>
    %c0_10 = arith.constant 0 : index
    %c0_11 = arith.constant 0 : index
    %14 = vector.load %arg6[%c0_10, %c0_11] : memref<64x64xbf16, #tpu.memory_space<vmem>>, vector<64x64xbf16>
    %15 = arith.truncf %13 : vector<64x256xf32> to vector<64x256xbf16>
    %cst_12 = arith.constant dense<0.000000e+00> : vector<64x256xf32>
    %16 = tpu.matmul %14, %15, %cst_12 {dimension_numbers = #tpu.dot_dimension_numbers<[1], [0], [0], [1], [0, 0, 1, 1], [], []>} : vector<64x64xbf16>, vector<64x256xbf16>, vector<64x256xf32> -> vector<64x256xf32>
    %c0_13 = arith.constant 0 : index
    %c0_14 = arith.constant 0 : index
    %17 = vector.load %arg7[%c0_13, %c0_14] : memref<64x1xf32, #tpu.memory_space<vmem>>, vector<64x1xf32>
    %18 = vector.broadcast %17 : vector<64x1xf32> to vector<64x256xf32>
    %19 = arith.addf %16, %18 : vector<64x256xf32>
    %cst_15 = arith.constant 0.000000e+00 : f32
    %20 = vector.broadcast %cst_15 : f32 to vector<64x256xf32>
    %21 = arith.maximumf %19, %20 : vector<64x256xf32>
    %c0_16 = arith.constant 0 : index
    %c0_17 = arith.constant 0 : index
    %22 = vector.load %arg8[%c0_16, %c0_17] : memref<1x64xbf16, #tpu.memory_space<vmem>>, vector<1x64xbf16>
    %23 = arith.truncf %21 : vector<64x256xf32> to vector<64x256xbf16>
    %cst_18 = arith.constant dense<0.000000e+00> : vector<1x256xf32>
    %24 = tpu.matmul %22, %23, %cst_18 {dimension_numbers = #tpu.dot_dimension_numbers<[1], [0], [0], [1], [0, 0, 1, 1], [], []>} : vector<1x64xbf16>, vector<64x256xbf16>, vector<1x256xf32> -> vector<1x256xf32>
    %c0_19 = arith.constant 0 : index
    %c0_20 = arith.constant 0 : index
    %25 = vector.load %arg9[%c0_19, %c0_20] : memref<1x1xf32, #tpu.memory_space<vmem>>, vector<1x1xf32>
    %26 = vector.broadcast %25 : vector<1x1xf32> to vector<1x256xf32>
    %27 = arith.addf %24, %26 : vector<1x256xf32>
    %c0_21 = arith.constant 0 : index
    %c0_22 = arith.constant 0 : index
    %28 = vector.load %arg10[%c0_21, %c0_22] : memref<1x256xf32, #tpu.memory_space<vmem>>, vector<1x256xf32>
    tpu.vector_store %arg10[%c0_21, %c0_22], %27 {strides = array<i32>} : memref<1x256xf32, #tpu.memory_space<vmem>>, vector<1x256xf32>,
    return
  }
  func.func @transform_0(%arg0: i32) -> (i32, i32) {
    %c0_i32 = arith.constant 0 : i32
    %c0_i32_0 = arith.constant 0 : i32
    return %c0_i32, %arg0 : i32, i32
  }
  func.func @transform_1(%arg0: i32) -> (i32, i32) {
    %c0_i32 = arith.constant 0 : i32
    %c0_i32_0 = arith.constant 0 : i32
    %c0_i32_1 = arith.constant 0 : i32
    return %c0_i32, %c0_i32_0 : i32, i32
  }
  func.func @transform_2(%arg0: i32) -> (i32, i32) {
    %c0_i32 = arith.constant 0 : i32
    %c0_i32_0 = arith.constant 0 : i32
    %c0_i32_1 = arith.constant 0 : i32
    return %c0_i32, %c0_i32_0 : i32, i32
  }
  func.func @transform_3(%arg0: i32) -> (i32, i32) {
    %c0_i32 = arith.constant 0 : i32
    %c0_i32_0 = arith.constant 0 : i32
    %c0_i32_1 = arith.constant 0 : i32
    return %c0_i32, %c0_i32_0 : i32, i32
  }
  func.func @transform_4(%arg0: i32) -> (i32, i32) {
    %c0_i32 = arith.constant 0 : i32
    %c0_i32_0 = arith.constant 0 : i32
    %c0_i32_1 = arith.constant 0 : i32
    return %c0_i32, %c0_i32_0 : i32, i32
  }
  func.func @transform_5(%arg0: i32) -> (i32, i32) {
    %c0_i32 = arith.constant 0 : i32
    %c0_i32_0 = arith.constant 0 : i32
    %c0_i32_1 = arith.constant 0 : i32
    return %c0_i32, %c0_i32_0 : i32, i32
  }
  func.func @transform_6(%arg0: i32) -> (i32, i32) {
    %c0_i32 = arith.constant 0 : i32
    %c0_i32_0 = arith.constant 0 : i32
    %c0_i32_1 = arith.constant 0 : i32
    return %c0_i32, %c0_i32_0 : i32, i32
  }
  func.func @transform_7(%arg0: i32) -> (i32, i32) {
    %c0_i32 = arith.constant 0 : i32
    %c0_i32_0 = arith.constant 0 : i32
    %c0_i32_1 = arith.constant 0 : i32
    return %c0_i32, %c0_i32_0 : i32, i32
  }
  func.func @transform_8(%arg0: i32) -> (i32, i32) {
    %c0_i32 = arith.constant 0 : i32
    %c0_i32_0 = arith.constant 0 : i32
    %c0_i32_1 = arith.constant 0 : i32
    return %c0_i32, %c0_i32_0 : i32, i32
  }
  func.func @transform_9(%arg0: i32) -> (i32, i32) {
    %c0_i32 = arith.constant 0 : i32
    %c0_i32_0 = arith.constant 0 : i32
    return %c0_i32, %arg0 : i32, i32
  }
}

</mosaic_0001>

<bundles_post_ra>
// kernel: tpu_custom_call.1
= control target key start
LH: loop header
LB: loop body
LE: loop exit
PB: predicated region body
PF: predicated region fallthrough
CT: control target
= control target key end

     0   :  { %s1582_s0 = inlined_call_operand.vmem [shape: bf16[4,512], index: 0, kind: input, shape index: {}]   ;;  %s1583_s1 = inlined_call_operand.vmem [shape: bf16[64,4], index: 1, kind: input, shape index: {}]   ;;  %s1584_s2 = inlined_call_operand.vmem [shape: f32[64,1], index: 2, kind: input, shape index: {}]   ;;  %s1585_s3 = inlined_call_operand.vmem [shape: bf16[64,64], index: 3, kind: input, shape index: {}]   ;;  %s1586_s4 = inlined_call_operand.vmem [shape: f32[64,1], index: 4, kind: input, shape index: {}]   ;;  %s1587_s5 = inlined_call_operand.vmem [shape: bf16[64,64], index: 5, kind: input, shape index: {}]   ;;  %s1588_s6 = inlined_call_operand.vmem [shape: f32[64,1], index: 6, kind: input, shape index: {}]   ;;  %s1589_s7 = inlined_call_operand.vmem [shape: bf16[1,64], index: 7, kind: input, shape index: {}]   ;;  %s1590_s8 = inlined_call_operand.<no memory space> [shape: f32[1,1], index: 8, kind: input, shape index: {}]   ;;  %s1591_s9 = inlined_call_operand.hbm [shape: f32[1,512], index: 9, kind: output, shape index: {}]  }
   0x1   :  { %v14_v0 = vstv %s1590_s8 }
   0x2   :  { %15 = vst [vmem:[#allocation2] sm:$0x1] %v14_v0 }
   0x3   :  { %16 = vsyncpa [#allocation4], 0 }
   0x4   :  { %18 = vsyncpa [#allocation4 + $0x1], 0  ;;  %s1344_s11 = smov 0   ;;  %s1346_s12 = smov 0  }
   0x5   :  { %s1348_s13 = smov 0   ;;  %s1350_s14 = smov 0  }
   0x6 LB: > { %s1365_s8 = sadd.s32 4294967295, %s1286_s14   ;;  %s1063_s15 = sadd.s32 4294967294, %s1286_s14   ;;  %s1286_s14 = sphi %s1350_s14, %s1597_s14   ;;  %s1282_s13 = sphi %s1348_s13, %s1596_s13   ;;  %s1278_s12 = sphi %s1346_s12, %s1595_s12   ;;  %s1274_s11 = sphi %s1344_s11, %s1594_s11  }
   0x7   : > { %s1369_s16 = sadd.s32 1, %s1286_s14   ;;  %s225_s17 = sadd.s32 1, %s1282_s13 }
   0x8   : > { %s222_s18 = ssub.s32 %s1286_s14, %s1369_s16  ;;  %p235_p0 = scmp.ne.s32.totalorder %s1282_s13, %s1278_s12 }
   0x9   : > { %p223_p1 = scmp.eq.s32.totalorder %s222_s18, 0  ;;  %p236_p2 = scmp.eq.s32.totalorder %s1365_s8, 1 }
   0xa   : > { %p241_p3 = scmp.ne.s32.totalorder %s1278_s12, %s1274_s11  ;;  %p242_p4 = scmp.eq.s32.totalorder %s1063_s15, 1 }
   0xb   : > { %s1380_s19 = scalar_select %p223_p1, %s1282_s13, %s225_s17  }
   0xc   : > { %p1382_p5 = por %p236_p2, %p235_p0  ;;  %p1386_p6 = por %p242_p4, %p241_p3 }
   0xd   : > { %p1066_p7 = scmp.ge.s32.totalorder %s1286_s14, 1  ;;  %p293_p8 = scmp.lt.s32.totalorder %s1286_s14, 3 }
   0xf   : > { %p294_p9 = pnand %p1066_p7, %p293_p8 }
  0x10   : > { %s1068_s22 = sshll.u32 (!%p294_p9), %s1365_s8, 1  ;;  %v1288_v1 = vmov (!%p294_p9), 0   ;;  %v346_v2 = vld [vmem:[%s1584_s2] sm:$0xff] (!%p294_p9)  ;;  %vm436_vm0 = vcmask (!%p294_p9), 1041408   ;;  %v348_v3 = vld [vmem:[%s1584_s2 + $0x10] sm:$0xff] (!%p294_p9)  ;;  %v347_v4 = vld [vmem:[%s1584_s2 + $0x8] sm:$0xff] (!%p294_p9) }
  0x11   : > { %297 = sbr.rel (%p294_p9) target bundleno = 1029 (0x405), region = 56  ;;  %p330_p10 = scmp.lt.s32.totalorder (!%p294_p9), %s1068_s22, 3  ;;  %475 = vmatprep.mubr.bf16.mxu0 (!%p294_p9), %v1288_v1  ;;  %495 = vmatprep.mubr.bf16.mxu1 (!%p294_p9), %v1288_v1  ;;  %v349_v8 = vld [vmem:[%s1584_s2 + $0x18] sm:$0xff] (!%p294_p9)  ;;  %v1148_v9 = vld [vmem:[%s1583_s1] sm:$0xff] (!%p294_p9)   ;;  %v1149_v10 = vld [vmem:[%s1583_s1 + $0x10] sm:$0xff] (!%p294_p9)   ;;  %vm423_vm1 = vcmask (!%p294_p9), 31744  }
  0x12   : > { %1146 = vset.pattern.permute.xlu0 (!%p294_p9), %v1288_v1  ;;  %1147 = vset.pattern.permute.xlu1 (!%p294_p9), %v1288_v1  ;;  %v350_v11 = vld [vmem:[%s1584_s2 + $0x20] sm:$0xff] (!%p294_p9)  ;;  %v352_v12 = vld [vmem:[%s1584_s2 + $0x30] sm:$0xff] (!%p294_p9)  ;;  %v351_v13 = vld [vmem:[%s1584_s2 + $0x28] sm:$0xff] (!%p294_p9)  ;;  %vm616_vm2 = vcmask (!%p294_p9), 523264   ;;  %s326_s23 = sand.u32 (!%p294_p9), 1, %s1278_s12  }
  0x13   : > { %356 = vperm.xlu0 (!%p294_p9), %1146, %v346_v2   ;;  %366 = vperm.xlu1 (!%p294_p9), %1147, %v348_v3   ;;  %v353_v14 = vld [vmem:[%s1584_s2 + $0x38] sm:$0xff] (!%p294_p9)  ;;  %v1150_v15 = vld [vmem:[%s1583_s1 + $0x8] sm:$0xff] (!%p294_p9)   ;;  %v548_v17 = vld [vmem:[%s1586_s4] sm:$0xff] (!%p294_p9)  ;;  %s1067_s24 = sshll.u32 (!%p294_p9), %s326_s23, 1  ;;  %s990_s10 = scalar_lea.sflag (!%p294_p9), [#allocation4], %s326_s23 }
  0x14   : > { %v1151_v16 = vld [vmem:[%s1583_s1 + $0x18] sm:$0xff] (!%p294_p9)   ;;  %v549_v18 = vld [vmem:[%s1586_s4 + $0x8] sm:$0xff] (!%p294_p9)  ;;  %v550_v19 = vld [vmem:[%s1586_s4 + $0x10] sm:$0xff] (!%p294_p9)  ;;  %s328_s26 = scalar_lea.vmem (!%p294_p9), [#allocation3], %s1067_s24 }
  0x15   : > { %v551_v20 = vld [vmem:[%s1586_s4 + $0x18] sm:$0xff] (!%p294_p9)  ;;  %v552_v21 = vld [vmem:[%s1586_s4 + $0x20] sm:$0xff] (!%p294_p9)  ;;  %v553_v22 = vld [vmem:[%s1586_s4 + $0x28] sm:$0xff] (!%p294_p9)  ;;  %s1004_s27 = sshll.u32 (!%p294_p9), %s328_s26, 4  ;;  %s1542_s27 = int_to_ptr.vmem [resolvable:$true] %s1004_s27 }
  0x16   : > { %v554_v23 = vld [vmem:[%s1586_s4 + $0x30] sm:$0xff] (!%p294_p9)  ;;  %v555_v24 = vld [vmem:[%s1586_s4 + $0x38] sm:$0xff] (!%p294_p9)  ;;  %v734_v25 = vld [vmem:[%s1588_s6] sm:$0xff] (!%p294_p9)  ;;  %s1224_s15 = scalar_lea.vmem (!%p294_p9), %s1542_s27, 32 }
  0x17   : > { %361 = vperm.xlu0 (!%p294_p9), %1146, %v347_v4   ;;  %371 = vperm.xlu1 (!%p294_p9), %1147, %v349_v8   ;;  %v735_v26 = vld [vmem:[%s1588_s6 + $0x8] sm:$0xff] (!%p294_p9)  ;;  %v736_v27 = vld [vmem:[%s1588_s6 + $0x10] sm:$0xff] (!%p294_p9)  ;;  %v737_v28 = vld [vmem:[%s1588_s6 + $0x18] sm:$0xff] (!%p294_p9)  ;;  %p1225_p11 = scmp.ne.s32.totalorder (!%p294_p9), %s1542_s27, %s1224_s15 }
  0x18   : > { %s1599_s22 = smov (!%p330_p10, %s1068_s22), 3  ;;  %v738_v29 = vld [vmem:[%s1588_s6 + $0x20] sm:$0xff]  ;;  %v739_v30 = vld [vmem:[%s1588_s6 + $0x28] sm:$0xff]  ;;  %v740_v31 = vld [vmem:[%s1588_s6 + $0x30] sm:$0xff] }
  0x19   : > { %s1069_s25 = sshll.u32 %s1599_s22, 1  ;;  %v741_v32 = vld [vmem:[%s1588_s6 + $0x38] sm:$0xff]  ;;  %v912_v33 = vld [vmem:[#allocation2] sm:$0x1]  ;;  %p1226_p12 = pnand %p1225_p11, %p1382_p5 }
  0x1a   : > { %s333_s30 = scalar_lea.vmem %s1582_s0, %s1069_s25  ;;  %s1102_s25 = sshll.u32 %s1365_s8, 5 }
  0x1b   : > { %v1074_v5 = vld.sshfl [vmem:[%s333_s30] sm:$0x33 pattern:$0x76325410]  ;;  %376 = vperm.xlu0 %1146, %v350_v11   ;;  %381 = vperm.xlu1 %1147, %v351_v13   ;;  %s1540_s30 = scalar_lea.hbm %s1591_s9, %s1102_s25  ;;  %p1227_p13 = pneg %p1226_p12 }
  0x1c   : > { %v422_v6 = vcombine.high %v1074_v5, %v1074_v5  ;;  %v438_v7 = vsel %vm436_vm0, %v1074_v5, 0  ;;  %s1290_s8 = smov [#allocation3]  }
  0x1d   : > { %s1228_s17 = sshll.u32 %s1290_s8, 4  ;;  %s1229_s17 = int_to_ptr.vmem [resolvable:$false] %s1228_s17 }
  0x1e   : > { %1075 = vmatprep.subr.msk.bf16.mxu0 %vm436_vm0, %v422_v6  ;;  %1103 = vmatprep.subr.msk.bf16.mxu1 %vm436_vm0, %v422_v6  ;;  %s1230_s18 = scalar_lea.vmem %s1229_s17, 64  ;;  %p1231_p0 = scmp.lt.s32.totalorder %s1542_s27, %s1229_s17 }
  0x1f   : > { %444 = vmatpush1.bf16.msra.mxu0 %v438_v7  ;;  %1104 = vmatpush1.bf16.msra.mxu1 %v438_v7  ;;  %p1232_p1 = scmp.lt.s32.totalorder %s1230_s18, %s1224_s15 }
  0x20   : > { %386 = vperm.xlu0 %1146, %v352_v12   ;;  %391 = vperm.xlu1 %1147, %v353_v14  }
  0x21   : > { %p1233_p2 = por %p1232_p1, %p1231_p0 }
  0x22   : > { %1076 = vmatmul.mubr.msk.bf16.vlgmr.msra.gmra.mrb[0].mxu0 %vm423_vm1, %v1148_v9  ;;  %1078 = vmatmul.mubr.msk.bf16.vlgmr.msra.gmra.mrb[0].mxu1 %vm423_vm1, %v1149_v10 }
  0x23   : > { %485 = vmatprep.mubr.bf16.mxu0 %v1288_v1  ;;  %505 = vmatprep.mubr.bf16.mxu1 %v1288_v1  ;;  %p1234_p3 = pnand %p1233_p2, %p1227_p13 }
  0x24   : > { %558 = vperm.xlu0 %1146, %v548_v17   ;;  %563 = vperm.xlu1 %1147, %v549_v18  }
  0x28   : > { %568 = vperm.xlu0 %1146, %v550_v19   ;;  %573 = vperm.xlu1 %1147, %v551_v20  }
  0x2a   : > { %1077 = vmatmul.mubr.msk.bf16.gmra.mrb[4].mxu0 %vm423_vm1, %v1150_v15  ;;  %1079 = vmatmul.mubr.msk.bf16.gmra.mrb[4].mxu1 %vm423_vm1, %v1151_v16 }
  0x2b   : > { %661 = vmatprep.mubr.bf16.mxu1 %v1288_v1  ;;  %846 = vmatprep.mubr.bf16.mxu0 %v1288_v1 }
  0x2c   : > { %578 = vperm.xlu0 %1146, %v552_v21   ;;  %583 = vperm.xlu1 %1147, %v553_v22  }
  0x30   : > { %588 = vperm.xlu0 %1146, %v554_v23   ;;  %593 = vperm.xlu1 %1147, %v555_v24  }
  0x34   : > { %744 = vperm.xlu0 %1146, %v734_v25   ;;  %749 = vperm.xlu1 %1147, %v735_v26  }
  0x38   : > { %754 = vperm.xlu0 %1146, %v736_v27   ;;  %759 = vperm.xlu1 %1147, %v737_v28  }
  0x3c   : > { %764 = vperm.xlu0 %1146, %v738_v29   ;;  %769 = vperm.xlu1 %1147, %v739_v30  }
  0x40   : > { %774 = vperm.xlu0 %1146, %v740_v31   ;;  %779 = vperm.xlu1 %1147, %v741_v32  }
  0x44   : > { %915 = vperm.xlu0 %1146, %v912_v33  }
  0x92   : > { %v357_v34 = vpop.permute.xlu0 %356  ;;  %v367_v35 = vpop.permute.xlu1 %366 }
  0x96   : > { %v362_v36 = vpop.permute.xlu0 %361  ;;  %v372_v37 = vpop.permute.xlu1 %371 }
  0x9a   : > { %v377_v38 = vpop.permute.xlu0 %376  ;;  %v382_v39 = vpop.permute.xlu1 %381 }
  0x9f   : > { %v387_v56 = vpop.permute.xlu0 %386  ;;  %v392_v57 = vpop.permute.xlu1 %391 }
  0xf5   : > { %v477_v40 = vpop.f32.mrb[0].mxu0  ;;  %v497_v41 = vpop.f32.mrb[0].mxu1 }
  0xf6   : > { %v478_v42 = vadd.f32 %v477_v40, %v357_v34  ;;  %v498_v43 = vadd.f32 %v497_v41, %v377_v38  ;;  %v479_v44 = vpop.f32.mrb[1].mxu0  ;;  %v499_v45 = vpop.f32.mrb[1].mxu1 }
  0xf7   : > { %v480_v46 = vadd.f32 %v479_v44, %v357_v34  ;;  %v500_v47 = vadd.f32 %v499_v45, %v377_v38  ;;  %v481_v48 = vpop.f32.mrb[2].mxu0  ;;  %v501_v49 = vpop.f32.mrb[2].mxu1  ;;  %v1155_v38 = vld [vmem:[%s1585_s3 + $0x18] sm:$0xff]  }
  0xf8   : > { %1160 = vtanh.f32 %v478_v42  ;;  %v482_v50 = vadd.f32 %v481_v48, %v362_v36  ;;  %v483_v51 = vpop.f32.mrb[3].mxu0  ;;  %v503_v52 = vpop.f32.mrb[3].mxu1  ;;  %v502_v53 = vadd.f32 %v501_v49, %v382_v39 }
  0xf9   : > { %1162 = vtanh.f32 %v498_v43  ;;  %v484_v54 = vadd.f32 %v483_v51, %v362_v36  ;;  %v504_v55 = vadd.f32 %v503_v52, %v382_v39  ;;  %v1153_v36 = vld [vmem:[%s1585_s3 + $0x8] sm:$0xff]   ;;  %v559_v39 = vpop.permute.xlu0 %558  ;;  %v564_v43 = vpop.permute.xlu1 %563 }
  0xfa   : > { %1164 = vtanh.f32 %v480_v46 }
  0xfb   : > { %1166 = vtanh.f32 %v500_v47 }
  0xfc   : > { %1168 = vtanh.f32 %v482_v50 }
  0xfd   : > { %1170 = vtanh.f32 %v502_v53  ;;  %v487_v58 = vpop.f32.mrb[4].mxu0  ;;  %v507_v59 = vpop.f32.mrb[4].mxu1 }
  0xfe   : > { %1172 = vtanh.f32 %v484_v54  ;;  %v488_v60 = vadd.f32 %v487_v58, %v367_v35  ;;  %v508_v61 = vadd.f32 %v507_v59, %v387_v56  ;;  %v489_v62 = vpop.f32.mrb[5].mxu0  ;;  %v509_v63 = vpop.f32.mrb[5].mxu1 }
  0xff   : > { %1174 = vtanh.f32 %v504_v55  ;;  %v490_v0 = vadd.f32 %v489_v62, %v367_v35  ;;  %v510_v2 = vadd.f32 %v509_v63, %v387_v56  ;;  %v491_v3 = vpop.f32.mrb[6].mxu0  ;;  %v511_v4 = vpop.f32.mrb[6].mxu1  ;;  %v1152_v35 = vld [vmem:[%s1585_s3] sm:$0xff]  }
 0x100   : > { %1176 = vtanh.f32 %v488_v60  ;;  %v492_v5 = vadd.f32 %v491_v3, %v372_v37  ;;  %v493_v6 = vpop.f32.mrb[7].mxu0  ;;  %v513_v7 = vpop.f32.mrb[7].mxu1  ;;  %v512_v8 = vadd.f32 %v511_v4, %v392_v57 }
 0x101   : > { %1178 = vtanh.f32 %v508_v61  ;;  %v494_v10 = vadd.f32 %v493_v6, %v372_v37  ;;  %v514_v12 = vadd.f32 %v513_v7, %v392_v57  ;;  %v1154_v37 = vld [vmem:[%s1585_s3 + $0x10] sm:$0xff]   ;;  %v569_v49 = vpop.permute.xlu0 %568  ;;  %v574_v53 = vpop.permute.xlu1 %573 }
 0x102   : > { %v1161_v9 = vpop.eup %1160  ;;  %1180 = vtanh.f32 %v490_v0 }
 0x103   : > { %v1163_v11 = vpop.eup %1162  ;;  %1182 = vtanh.f32 %v510_v2 }
 0x104   : > { %v1165_v13 = vpop.eup %1164  ;;  %1184 = vtanh.f32 %v492_v5 }
 0x105   : > { %v1167_v14 = vpop.eup %1166  ;;  %1186 = vtanh.f32 %v512_v8  ;;  %v579_v63 = vpop.permute.xlu0 %578 }
 0x106   : > { %v1169_v15 = vpop.eup %1168  ;;  %1188 = vtanh.f32 %v494_v10  ;;  %v584_v6 = vpop.permute.xlu1 %583 }
 0x107   : > { %v1171_v16 = vpop.eup %1170  ;;  %1190 = vtanh.f32 %v514_v12  ;;  %v540_v17 = vpack.c.bf16 %v1169_v15, %v1161_v9 }
 0x108   : > { %v1173_v18 = vpop.eup %1172  ;;  %v544_v19 = vpack.c.bf16 %v1171_v16, %v1163_v11 }
 0x109   : > { %v1175_v20 = vpop.eup %1174  ;;  %v541_v21 = vpack.c.bf16 %v1173_v18, %v1165_v13  ;;  %v589_v16 = vpop.permute.xlu0 %588 }
 0x10a   : > { %v1177_v22 = vpop.eup %1176  ;;  %v545_v23 = vpack.c.bf16 %v1175_v20, %v1167_v14 }
 0x10b   : > { %v1179_v24 = vpop.eup %1178  ;;  %629 = vmatprep.subr.bf16.mxu1 %v541_v21 }
 0x10c   : > { %v1181_v25 = vpop.eup %1180  ;;  %630 = vmatpush1.bf16.msra.mxu1 %v540_v17 }
 0x10d   : > { %v1183_v26 = vpop.eup %1182 }
 0x10e   : > { %v1185_v27 = vpop.eup %1184 }
 0x10f   : > { %v1187_v28 = vpop.eup %1186  ;;  %v542_v29 = vpack.c.bf16 %v1185_v27, %v1177_v22  ;;  %v594_v22 = vpop.permute.xlu1 %593 }
 0x110   : > { %v1189_v30 = vpop.eup %1188  ;;  %v546_v31 = vpack.c.bf16 %v1187_v28, %v1179_v24 }
 0x111   : > { %v1191_v32 = vpop.eup %1190  ;;  %v543_v33 = vpack.c.bf16 %v1189_v30, %v1181_v25 }
 0x112   : > { %v547_v34 = vpack.c.bf16 %v1191_v32, %v1183_v26 }
 0x113   : > { %631 = vmatprep.subr.bf16.mxu1 %v543_v33 }
 0x114   : > { %632 = vmatpush1.bf16.msra.mxu1 %v542_v29 }
 0x115   : > { %633 = vmatprep.subr.bf16.mxu1 %v545_v23 }
 0x118   : > { %634 = vmatpush1.bf16.msra.mxu1 %v544_v19 }
 0x119   : > { %635 = vmatprep.subr.bf16.mxu1 %v547_v34 }
 0x11c   : > { %636 = vmatpush1.bf16.msra.mxu1 %v546_v31 }
 0x11f   : > { %1084 = vmatmul.mubr.msk.bf16.vlgmr.msra.gmra.mrb[8].mxu1 %vm616_vm2, %v1152_v35 }
 0x120   : > { %671 = vmatprep.mubr.bf16.mxu1 %v1288_v1 }
 0x127   : > { %1085 = vmatmul.mubr.msk.bf16.gmra.mrb[12].mxu1 %vm616_vm2, %v1153_v36 }
 0x128   : > { %681 = vmatprep.mubr.bf16.mxu1 %v1288_v1 }
 0x12f   : > { %1086 = vmatmul.mubr.msk.bf16.gmra.mrb[16].mxu1 %vm616_vm2, %v1154_v37 }
 0x130   : > { %691 = vmatprep.mubr.bf16.mxu1 %v1288_v1 }
 0x137   : > { %1087 = vmatmul.mubr.msk.bf16.gmra.mrb[20].mxu1 %vm616_vm2, %v1155_v38 }
 0x138   : > { %957 = vmatprep.mubr.bf16.mxu1 %v1288_v1 }
 0x1f2   : > { %v663_v40 = vpop.f32.mrb[8].mxu1 }
 0x1f3   : > { %v664_v41 = vadd.f32 %v663_v40, %v559_v39  ;;  %v665_v42 = vpop.f32.mrb[9].mxu1  ;;  %v1156_v40 = vld [vmem:[%s1587_s5] sm:$0xff]  }
 0x1f4   : > { %v666_v44 = vadd.f32 %v665_v42, %v559_v39  ;;  %v667_v45 = vpop.f32.mrb[10].mxu1  ;;  %v1158_v42 = vld [vmem:[%s1587_s5 + $0x10] sm:$0xff]  }
 0x1f5   : > { %1192 = vtanh.f32 %v664_v41  ;;  %v668_v46 = vadd.f32 %v667_v45, %v564_v43  ;;  %v669_v47 = vpop.f32.mrb[11].mxu1  ;;  %v1157_v41 = vld [vmem:[%s1587_s5 + $0x8] sm:$0xff]  }
 0x1f6   : > { %1194 = vtanh.f32 %v666_v44  ;;  %v670_v48 = vadd.f32 %v669_v47, %v564_v43  ;;  %v1159_v43 = vld [vmem:[%s1587_s5 + $0x18] sm:$0xff]   ;;  %v745_v44 = vpop.permute.xlu0 %744 }
 0x1f7   : > { %1196 = vtanh.f32 %v668_v46 }
 0x1f8   : > { %1198 = vtanh.f32 %v670_v48  ;;  %v750_v48 = vpop.permute.xlu1 %749 }
 0x1fa   : > { %v673_v50 = vpop.f32.mrb[12].mxu1 }
 0x1fb   : > { %v674_v51 = vadd.f32 %v673_v50, %v569_v49  ;;  %v675_v52 = vpop.f32.mrb[13].mxu1 }
 0x1fc   : > { %v676_v54 = vadd.f32 %v675_v52, %v569_v49  ;;  %v677_v55 = vpop.f32.mrb[14].mxu1 }
 0x1fd   : > { %1200 = vtanh.f32 %v674_v51  ;;  %v678_v56 = vadd.f32 %v677_v55, %v574_v53  ;;  %v679_v57 = vpop.f32.mrb[15].mxu1 }
 0x1fe   : > { %1202 = vtanh.f32 %v676_v54  ;;  %v680_v58 = vadd.f32 %v679_v57, %v574_v53 }
 0x1ff   : > { %v1193_v59 = vpop.eup %1192  ;;  %1204 = vtanh.f32 %v678_v56 }
 0x200   : > { %v1195_v60 = vpop.eup %1194  ;;  %1206 = vtanh.f32 %v680_v58  ;;  %v755_v58 = vpop.permute.xlu0 %754 }
 0x201   : > { %v1197_v61 = vpop.eup %1196 }
 0x202   : > { %v1199_v62 = vpop.eup %1198  ;;  %v683_v0 = vpop.f32.mrb[16].mxu1  ;;  %v726_v2 = vpack.c.bf16 %v1197_v61, %v1193_v59 }
 0x203   : > { %v684_v3 = vadd.f32 %v683_v0, %v579_v63  ;;  %v685_v4 = vpop.f32.mrb[17].mxu1  ;;  %v727_v5 = vpack.c.bf16 %v1199_v62, %v1195_v60 }
 0x204   : > { %v686_v7 = vadd.f32 %v685_v4, %v579_v63  ;;  %v687_v8 = vpop.f32.mrb[18].mxu1  ;;  %v760_v63 = vpop.permute.xlu1 %759 }
 0x205   : > { %1208 = vtanh.f32 %v684_v3  ;;  %v688_v9 = vadd.f32 %v687_v8, %v584_v6  ;;  %v689_v10 = vpop.f32.mrb[19].mxu1  ;;  %814 = vmatprep.subr.bf16.mxu0 %v727_v5 }
 0x206   : > { %1210 = vtanh.f32 %v686_v7  ;;  %v690_v11 = vadd.f32 %v689_v10, %v584_v6  ;;  %815 = vmatpush1.bf16.msra.mxu0 %v726_v2 }
 0x207   : > { %v1201_v12 = vpop.eup %1200  ;;  %1212 = vtanh.f32 %v688_v9 }
 0x208   : > { %v1203_v13 = vpop.eup %1202  ;;  %1214 = vtanh.f32 %v690_v11  ;;  %v765_v11 = vpop.permute.xlu0 %764 }
 0x209   : > { %v1205_v14 = vpop.eup %1204 }
 0x20a   : > { %v1207_v15 = vpop.eup %1206  ;;  %v693_v17 = vpop.f32.mrb[20].mxu1  ;;  %v728_v18 = vpack.c.bf16 %v1205_v14, %v1201_v12 }
 0x20b   : > { %v694_v19 = vadd.f32 %v693_v17, %v589_v16  ;;  %v695_v20 = vpop.f32.mrb[21].mxu1  ;;  %v729_v21 = vpack.c.bf16 %v1207_v15, %v1203_v13 }
 0x20c   : > { %v696_v23 = vadd.f32 %v695_v20, %v589_v16  ;;  %v697_v24 = vpop.f32.mrb[22].mxu1  ;;  %v770_v16 = vpop.permute.xlu1 %769 }
 0x20d   : > { %1216 = vtanh.f32 %v694_v19  ;;  %v698_v25 = vadd.f32 %v697_v24, %v594_v22  ;;  %v699_v26 = vpop.f32.mrb[23].mxu1  ;;  %816 = vmatprep.subr.bf16.mxu0 %v729_v21 }
 0x20e   : > { %1218 = vtanh.f32 %v696_v23  ;;  %v700_v27 = vadd.f32 %v699_v26, %v594_v22  ;;  %817 = vmatpush1.bf16.msra.mxu0 %v728_v18 }
 0x20f   : > { %v1209_v28 = vpop.eup %1208  ;;  %1220 = vtanh.f32 %v698_v25 }
 0x210   : > { %v1211_v29 = vpop.eup %1210  ;;  %1222 = vtanh.f32 %v700_v27  ;;  %v775_v27 = vpop.permute.xlu0 %774 }
 0x211   : > { %v1213_v30 = vpop.eup %1212 }
 0x212   : > { %v1215_v31 = vpop.eup %1214  ;;  %v730_v32 = vpack.c.bf16 %v1213_v30, %v1209_v28 }
 0x213   : > { %v731_v33 = vpack.c.bf16 %v1215_v31, %v1211_v29 }
 0x215   : > { %818 = vmatprep.subr.bf16.mxu0 %v731_v33 }
 0x216   : > { %819 = vmatpush1.bf16.msra.mxu0 %v730_v32  ;;  %v780_v32 = vpop.permute.xlu1 %779 }
 0x217   : > { %v1217_v34 = vpop.eup %1216 }
 0x218   : > { %v1219_v35 = vpop.eup %1218 }
 0x219   : > { %v1221_v36 = vpop.eup %1220 }
 0x21a   : > { %v1223_v37 = vpop.eup %1222  ;;  %v732_v38 = vpack.c.bf16 %v1221_v36, %v1217_v34 }
 0x21b   : > { %v733_v39 = vpack.c.bf16 %v1223_v37, %v1219_v35 }
 0x21d   : > { %820 = vmatprep.subr.bf16.mxu0 %v733_v39 }
 0x21e   : > { %821 = vmatpush1.bf16.msra.mxu0 %v732_v38 }
 0x221   : > { %1092 = vmatmul.mubr.msk.bf16.vlgmr.msra.gmra.mrb[8].mxu0 %vm616_vm2, %v1156_v40 }
 0x222   : > { %856 = vmatprep.mubr.bf16.mxu0 %v1288_v1 }
 0x229   : > { %1093 = vmatmul.mubr.msk.bf16.gmra.mrb[12].mxu0 %vm616_vm2, %v1157_v41 }
 0x22a   : > { %866 = vmatprep.mubr.bf16.mxu0 %v1288_v1 }
 0x231   : > { %1094 = vmatmul.mubr.msk.bf16.gmra.mrb[16].mxu0 %vm616_vm2, %v1158_v42 }
 0x232   : > { %876 = vmatprep.mubr.bf16.mxu0 %v1288_v1 }
 0x239   : > { %1095 = vmatmul.mubr.msk.bf16.gmra.mrb[20].mxu0 %vm616_vm2, %v1159_v43 }
 0x2f4   : > { %v848_v45 = vpop.f32.mrb[8].mxu0 }
 0x2f5   : > { %v849_v46 = vadd.f32 %v848_v45, %v745_v44  ;;  %v850_v47 = vpop.f32.mrb[9].mxu0  ;;  %v918_v45 = vlaneseq }
 0x2f6   : > { %v851_v49 = vadd.f32 %v850_v47, %v745_v44  ;;  %v852_v50 = vpop.f32.mrb[10].mxu0  ;;  %v903_v44 = vld [vmem:[%s1589_s7] sm:$0x1]  ;;  %v1289_v47 = vmov 1966171168  }
 0x2f7   : > { %v853_v51 = vadd.f32 %v852_v50, %v750_v48  ;;  %v854_v52 = vpop.f32.mrb[11].mxu0  ;;  %v887_v54 = vmax.f32 %v849_v46, 0.0  ;;  %v919_v46 = vshrl.u32 %v918_v45, 7  ;;  %v916_v50 = vpop.permute.xlu0 %915  ;;  %vm986_vm3 = vcmp.lt.s32.totalorder %v918_v45, 256 }
 0x2f8   : > { %v855_v53 = vadd.f32 %v854_v52, %v750_v48  ;;  %v888_v56 = vmax.f32 %v851_v49, 0.0  ;;  %v970_v48 = vunpack.c.l.s4 %v1289_v47 }
 0x2f9   : > { %v889_v55 = vmax.f32 %v853_v51, 0.0  ;;  %v920_v49 = vsub.s32 0, %v919_v46 }
 0x2fa   : > { %v890_v1 = vmax.f32 %v855_v53, 0.0  ;;  %v971_v51 = vunpack.c.0.s8 %v970_v48 }
 0x2fb   : > { %v904_v57 = vpack.c.bf16 %v889_v55, %v887_v54  ;;  %v921_v52 = vrot.slane %v916_v50, %v920_v49 }
 0x2fc   : > { %v905_v59 = vpack.c.bf16 %v890_v1, %v888_v56  ;;  %v858_v60 = vpop.f32.mrb[12].mxu0  ;;  %v974_v1 = vsub.s32 %v971_v51, %v919_v46 }
 0x2fd   : > { %v859_v61 = vadd.f32 %v858_v60, %v755_v58  ;;  %v860_v62 = vpop.f32.mrb[13].mxu0 }
 0x2fe   : > { %v861_v0 = vadd.f32 %v860_v62, %v755_v58  ;;  %v862_v2 = vpop.f32.mrb[14].mxu0  ;;  %925 = vmatprep.subr.bf16.mxu1 %v905_v59 }
 0x2ff   : > { %v863_v3 = vadd.f32 %v862_v2, %v760_v63  ;;  %v864_v4 = vpop.f32.mrb[15].mxu0  ;;  %926 = vmatpush1.bf16.msra.mxu1 %v904_v57  ;;  %v891_v6 = vmax.f32 %v859_v61, 0.0 }
 0x300   : > { %v865_v5 = vadd.f32 %v864_v4, %v760_v63  ;;  %v892_v8 = vmax.f32 %v861_v0, 0.0 }
 0x301   : > { %v893_v7 = vmax.f32 %v863_v3, 0.0 }
 0x302   : > { %v894_v9 = vmax.f32 %v865_v5, 0.0 }
 0x303   : > { %v906_v10 = vpack.c.bf16 %v893_v7, %v891_v6 }
 0x304   : > { %v907_v12 = vpack.c.bf16 %v894_v9, %v892_v8  ;;  %v868_v13 = vpop.f32.mrb[16].mxu0 }
 0x305   : > { %v869_v14 = vadd.f32 %v868_v13, %v765_v11  ;;  %v870_v15 = vpop.f32.mrb[17].mxu0 }
 0x306   : > { %v871_v17 = vadd.f32 %v870_v15, %v765_v11  ;;  %v872_v18 = vpop.f32.mrb[18].mxu0  ;;  %927 = vmatprep.subr.bf16.mxu1 %v907_v12 }
 0x307   : > { %v873_v19 = vadd.f32 %v872_v18, %v770_v16  ;;  %v874_v20 = vpop.f32.mrb[19].mxu0  ;;  %928 = vmatpush1.bf16.msra.mxu1 %v906_v10  ;;  %v895_v22 = vmax.f32 %v869_v14, 0.0 }
 0x308   : > { %v875_v21 = vadd.f32 %v874_v20, %v770_v16  ;;  %v896_v24 = vmax.f32 %v871_v17, 0.0 }
 0x309   : > { %v897_v23 = vmax.f32 %v873_v19, 0.0 }
 0x30a   : > { %v898_v25 = vmax.f32 %v875_v21, 0.0 }
 0x30b   : > { %v908_v26 = vpack.c.bf16 %v897_v23, %v895_v22 }
 0x30c   : > { %v909_v28 = vpack.c.bf16 %v898_v25, %v896_v24  ;;  %v878_v29 = vpop.f32.mrb[20].mxu0 }
 0x30d   : > { %v879_v30 = vadd.f32 %v878_v29, %v775_v27  ;;  %v880_v31 = vpop.f32.mrb[21].mxu0 }
 0x30e   : > { %v881_v33 = vadd.f32 %v880_v31, %v775_v27  ;;  %v882_v34 = vpop.f32.mrb[22].mxu0  ;;  %929 = vmatprep.subr.bf16.mxu1 %v909_v28 }
 0x30f   : > { %v883_v35 = vadd.f32 %v882_v34, %v780_v32  ;;  %v884_v36 = vpop.f32.mrb[23].mxu0  ;;  %930 = vmatpush1.bf16.msra.mxu1 %v908_v26  ;;  %v899_v38 = vmax.f32 %v879_v30, 0.0 }
 0x310   : > { %v885_v37 = vadd.f32 %v884_v36, %v780_v32  ;;  %v900_v40 = vmax.f32 %v881_v33, 0.0 }
 0x311   : > { %v901_v39 = vmax.f32 %v883_v35, 0.0 }
 0x312   : > { %v902_v41 = vmax.f32 %v885_v37, 0.0 }
 0x313   : > { %v910_v42 = vpack.c.bf16 %v901_v39, %v899_v38 }
 0x314   : > { %v911_v43 = vpack.c.bf16 %v902_v41, %v900_v40 }
 0x316   : > { %931 = vmatprep.subr.bf16.mxu1 %v911_v43 }
 0x317   : > { %932 = vmatpush1.bf16.msra.mxu1 %v910_v42 }
 0x31a   : > { %1096 = vmatmul.mubr.msk.bf16.vlgmr.msra.gmra.mrb[24].mxu1 %vm616_vm2, %v903_v44 }
 0x3ed   : > { %v959_v53 = vpop.f32.mrb[24].mxu1 }
 0x3ee   : > { %v960_v54 = vadd.f32 %v959_v53, %v921_v52  ;;  %v961_v55 = vpop.f32.mrb[25].mxu1 }
 0x3ef   : > { %v962_v56 = vadd.f32 %v961_v55, %v921_v52  ;;  %v963_v57 = vpop.f32.mrb[26].mxu1 }
 0x3f0   : > { %v964_v58 = vpop.f32.mrb[27].mxu1 }
 0x3f1   : > { %v968_v59 = vcombine.low %v960_v54, %v962_v56 }
 0x3f3   : > { %v975_v60 = vrot.slane %v968_v59, %v974_v1 }
 0x3f5   : > { %v982_v61 = vrot.slane %v975_v60, %v974_v1 }
 0x3f7   : > { %988 = vst.msk [vmem:[%s328_s26] sm:$0x3] %vm986_vm3, %v982_v61 }
 0x3f8   : > { %1237 = shalt.err (!%p1234_p3)
}
 0x3f9   : > { %s1238_s22 = scalar_lea.hbm %s1540_s30, 32  ;;  %s1242_s25 = scalar_lea.hbm %s1591_s9, 64 }
 0x3fa   : > { %p1239_p4 = scmp.ne.s32.totalorder %s1540_s30, %s1238_s22  ;;  %p1243_p9 = scmp.lt.u32.totalorder %s1540_s30, %s1591_s9 }
 0x3fb   : > { %p1244_p10 = scmp.lt.u32.totalorder %s1242_s25, %s1238_s22  ;;  %p1246_p12 = scmp.lt.u32.totalorder %s1238_s22, %s1540_s30 }
 0x3fc   : > { %p1240_p7 = pnand %p1239_p4, %p1382_p5 }
 0x3fd   : > { %p1245_p11 = por %p1244_p10, %p1243_p9 }
 0x3fe   : > { %p1241_p8 = pneg %p1240_p7 }
 0x3ff   : > { %p1247_p13 = por %p1246_p12, %p1245_p11 }
 0x401   : > { %p1248_p0 = pnand %p1247_p13, %p1241_p8 }
 0x403   : > { %1251 = shalt.err (!%p1248_p0)
}
 0x404   : > { %1105 = dma.vmem_to_hbm [thread:$0]  (%p1382_p5), %s1542_s27, 32, %s1540_s30, %s990_s10  }
 0x405 PF: > { %p1111_p1 = scmp.ge.s32.totalorder %s1286_s14, 2  ;;  %s1016_s29 = sand.u32 1, %s1274_s11  }
 0x406   : > { %s1017_s15 = scalar_lea.sflag [#allocation4], %s1016_s29 }
 0x407   : > { %p1108_p2 = pnand %p1111_p1, %p1386_p6 }
 0x409   : > { %1269 = dma.done.wait (!%p1108_p2), %s1017_s15, 32  }
 0x40a   : > { %1271 = vsyncadd (!%p1108_p2), %s1017_s15, 4294967264  ;;  %p21_p3 = scmp.ge.s32.totalorder %s1369_s16, 4   ;;  %s1594_s11 = smov %s1278_s12 }
 0x40b   : > { %s1595_s12 = smov %s1282_s13  ;;  %s1596_s13 = smov %s1380_s19 }
 0x40c   : > { %s1597_s14 = smov %s1369_s16  ;;  %23 = sbr.rel (!%p21_p3) target bundleno = 6 (0x6), region = 91 }
 0x413   :  { %1022 = vsyncpa [#allocation4], 1 }
 0x414   :  { %1024 = vsyncpa [#allocation4 + $0x1], 1 }

</bundles_post_ra>
